<compile_context>
chip_gen: v6e
topology: v6e:2x2x1
jax: 0.10.0
libtpu: 0.0.40
codegen_flags: <defaults>
</compile_context>

<pallas_src>
import functools

import jax
import jax.numpy as jnp
from jax.experimental import pallas as pl
from jax.experimental.pallas import tpu as pltpu


def _sigmoid(x):
    # One EUP transcendental per element (tanh) instead of exp + divide; the
    # EUP has a single VLIW slot and sits on the gating critical path.
    return 0.5 * jnp.tanh(0.5 * x) + 0.5


def gru_cell_kernel(x_ref, h_ref, wx_ref, bx_ref, uzr_ref, uh_ref,
                    wgl_ref, bgl_ref, o_ref, *, hidden, n_sub):
    H = hidden
    cdt = wx_ref.dtype                      # MXU operand dtype (bf16 or f32)
    sub_b = x_ref.shape[0] // n_sub

    bx = bx_ref[...]                        # [1, 3H] f32 (folded biases)
    bgl = bgl_ref[...]                      # [1, 2H] f32

    # Static unrolled loop: the n_sub chains are independent, so the scheduler
    # can run sub-tile i+1's xw/hu matmuls while sub-tile i is in its
    # sigmoid -> ci matmul -> gl matmul -> sigmoid phase (MXU/EUP overlap).
    for s in range(n_sub):
        rows = pl.ds(s * sub_b, sub_b)
        x = x_ref[rows, :]
        h = h_ref[rows, :].astype(jnp.float32)   # gating math stays in f32

        # x @ [W_z | W_r | W_h] + folded biases     -> [sub_b, 3H] (f32 acc)
        xw = jnp.dot(x.astype(cdt), wx_ref[...],
                     preferred_element_type=jnp.float32) + bx
        # h @ [U_z | U_r]                           -> [sub_b, 2H]
        hu = jnp.dot(h.astype(cdt), uzr_ref[...],
                     preferred_element_type=jnp.float32)

        z = _sigmoid(xw[:, 0:H] + hu[:, 0:H])
        r = _sigmoid(xw[:, H:2 * H] + hu[:, H:2 * H])

        # candidate_input = x@W_h + (r*h)@U_h + (b_Wh + b_Uh + bias_h)
        # NOTE: on the bf16 path ci is cast to bf16 for the W_g/W_l matmul
        # (extra rounding vs the f32 reference); use compute_dtype=f32 for
        # exact semantics.
        ci = xw[:, 2 * H:3 * H] + jnp.dot((r * h).astype(cdt), uh_ref[...],
                                          preferred_element_type=jnp.float32)

        # candidate_input @ [W_g | W_l] + [b_g | b_l]  -> [sub_b, 2H]
        gl = jnp.dot(ci.astype(cdt), wgl_ref[...],
                     preferred_element_type=jnp.float32) + bgl
        gate = _sigmoid(gl[:, 0:H])
        candidate = gl[:, H:2 * H] * gate

        # h_new = z*candidate + (1-z)*h == h + z*(candidate - h)
        # (padded hidden lanes give z=gate=0.5, candidate=0, h=0 -> 0: benign,
        #  and they are sliced away in the wrapper anyway.)
        o_ref[rows, :] = (h + z * (candidate - h)).astype(o_ref.dtype)


def _round_up(n, m):
    return ((n + m - 1) // m) * m


def _pad_to(a, shape):
    return jnp.pad(a, [(0, t - s) for s, t in zip(a.shape, shape)])


def pack_gru_params(params, *, compute_dtype=jnp.bfloat16):
    """Fuse / pad / cast the GRU weights ONCE (call outside any RNN loop)."""
    f32 = jnp.float32
    p = {k: jnp.asarray(v, f32) for k, v in params.items()}
    D_in, H = p["W_z"].shape
    Hp = _round_up(H, 128)

    def pad_in(w):   # [D_in, H] -> [D_in, Hp]
        return _pad_to(w, (D_in, Hp))

    def pad_hh(w):   # [H, H] -> [Hp, Hp]
        return _pad_to(w, (Hp, Hp))

    def pad_b(b):    # [1, H] -> [1, Hp]
        return _pad_to(b, (1, Hp))

    w_x = jnp.concatenate(
        [pad_in(p["W_z"]), pad_in(p["W_r"]), pad_in(p["W_h"])],
        axis=1).astype(compute_dtype)
    u_zr = jnp.concatenate(
        [pad_hh(p["U_z"]), pad_hh(p["U_r"])], axis=1).astype(compute_dtype)
    u_h = pad_hh(p["U_h"]).astype(compute_dtype)
    w_gl = jnp.concatenate(
        [pad_hh(p["W_g"]), pad_hh(p["W_l"])], axis=1).astype(compute_dtype)

    # Folded f32 biases (added once to the f32 accumulators).
    b_x = jnp.concatenate([
        pad_b(p["b_Wz"] + p["b_Uz"]),
        pad_b(p["b_Wr"] + p["b_Ur"]),
        pad_b(p["b_Wh"] + p["b_Uh"] + p["bias_h"]),
    ], axis=1)
    b_gl = jnp.concatenate([pad_b(p["b_g"]), pad_b(p["b_l"])], axis=1)

    return dict(w_x=w_x, b_x=b_x, u_zr=u_zr, u_h=u_h, w_gl=w_gl, b_gl=b_gl,
                D_in=int(D_in), H=int(H), Hp=int(Hp),
                compute_dtype=compute_dtype)


def custom_gru_cell(x, h, packed, *, tile_b=None):
    """Fused GRU-cell forward.  x: [B, D_in], h: [B, H] -> [B, H]."""
    B, D_in = x.shape
    H = h.shape[1]
    assert D_in == packed["D_in"] and H == packed["H"]
    Hp = packed["Hp"]
    cdt = packed["compute_dtype"]

    act_dtype = jnp.bfloat16 if cdt == jnp.bfloat16 else jnp.float32
    act_itemsize = 2 if act_dtype == jnp.bfloat16 else 4
    sub_mult = 16 if act_dtype == jnp.bfloat16 else 8   # sublane pack multiple

    # Generation-aware VMEM plan.
    try:
        vmem_cap = int(pltpu.get_tpu_info().vmem_capacity_bytes)
    except Exception:
        vmem_cap = 128 * 1024 * 1024
    small_vmem = vmem_cap <= 96 * 1024 * 1024   # v7x-class: 64 MiB per TC

    Bp0 = _round_up(B, sub_mult)
    if tile_b is None:
        # v5e/v6e (128 MiB VMEM): big batch tiles amortize per-step overhead.
        # v7x: weights + f32 temporaries leave less headroom -> smaller tiles.
        tile_b = (128 if Hp >= 1024 else 256) if small_vmem else 512
    tile_b = min(_round_up(tile_b, sub_mult), Bp0)
    if small_vmem and tile_b >= Bp0 and Bp0 >= 2 * sub_mult:
        # v7x has 2 TensorCores: give the "parallel" grid axis >= 2 steps.
        tile_b = _round_up(-(-Bp0 // 2), sub_mult)
    elif tile_b >= 2 * sub_mult:
        # Make the tile splittable into 2 sublane-aligned sub-tiles in-kernel.
        tile_b = _round_up(tile_b, 2 * sub_mult)
    Bp = _round_up(Bp0, tile_b)
    n_sub = 2 if (tile_b >= 2 * sub_mult and tile_b % (2 * sub_mult) == 0) else 1

    x_p = _pad_to(x, (Bp, D_in)).astype(act_dtype)
    h_p = _pad_to(h, (Bp, Hp)).astype(act_dtype)   # kernel upcasts to f32

    w_x, b_x = packed["w_x"], packed["b_x"]
    u_zr, u_h = packed["u_zr"], packed["u_h"]
    w_gl, b_gl = packed["w_gl"], packed["b_gl"]

    # VMEM budget: single-buffered resident weights (Buffered(1)),
    # double-buffered activation tiles, and the compiler-managed f32
    # temporaries (xw 3Hp + hu 2Hp + gl 2Hp + z/r/ci/candidate ~ 4Hp per row).
    weight_bytes = sum(int(a.size) * a.dtype.itemsize
                       for a in (w_x, b_x, u_zr, u_h, w_gl, b_gl))
    act_bytes = (2 * tile_b * (D_in + Hp) * act_itemsize
                 + 2 * tile_b * Hp * h.dtype.itemsize)
    interm_bytes = tile_b * 11 * Hp * 4
    vmem_needed = weight_bytes + act_bytes + interm_bytes

    compiler_kwargs = dict(dimension_semantics=("parallel",))
    # v5e's default scoped-VMEM limit is only 16 MiB (32 MiB on v6e/v7x), so
    # override early; cap at ~75% of physical VMEM (~48 MiB v7x, ~96 MiB v6e).
    if vmem_needed > 12 * 1024 * 1024:
        cap = int(0.75 * vmem_cap)
        compiler_kwargs["vmem_limit_bytes"] = min(
            max(int(1.3 * vmem_needed), 32 * 1024 * 1024), cap)
    # TODO(synk): for Hp >~ 1536 on v7x (bf16 fused weights ~40+ MiB), keep the
    # fused weights in HBM (memory_space=pl.ANY) and pipeline over the hidden
    # axis with pltpu.emit_pipeline instead of holding them VMEM-resident.

    const_idx = lambda b: (0, 0)
    resident = pl.Buffered(1)   # constant block index -> no double-buffering

    in_specs = [
        pl.BlockSpec((tile_b, D_in), lambda b: (b, 0)),                   # x
        pl.BlockSpec((tile_b, Hp), lambda b: (b, 0)),                     # h
        pl.BlockSpec((D_in, 3 * Hp), const_idx, pipeline_mode=resident),  # Wx
        pl.BlockSpec((1, 3 * Hp), const_idx, pipeline_mode=resident),     # b_x
        pl.BlockSpec((Hp, 2 * Hp), const_idx, pipeline_mode=resident),    # Uzr
        pl.BlockSpec((Hp, Hp), const_idx, pipeline_mode=resident),        # U_h
        pl.BlockSpec((Hp, 2 * Hp), const_idx, pipeline_mode=resident),    # Wgl
        pl.BlockSpec((1, 2 * Hp), const_idx, pipeline_mode=resident),     # b_gl
    ]
    out_specs = pl.BlockSpec((tile_b, Hp), lambda b: (b, 0))

    out = pl.pallas_call(
        functools.partial(gru_cell_kernel, hidden=Hp, n_sub=n_sub),
        out_shape=jax.ShapeDtypeStruct((Bp, Hp), h.dtype),
        grid=(Bp // tile_b,),
        in_specs=in_specs,
        out_specs=out_specs,
        compiler_params=pltpu.CompilerParams(**compiler_kwargs),
    )(x_p, h_p, w_x, b_x, u_zr, u_h, w_gl, b_gl)

    # TODO(synk): when this cell is unrolled over time in an RNN, move the T
    # loop into the kernel (grid=(T,), "arbitrary", h carried in VMEM scratch
    # with input_output_aliases) and hoist the x-projection to one big
    # [T*B, D_in] x [D_in, 3H] XLA matmul so weights are DMA'd once/sequence.
    return out[:B, :H]


def init_params(key, input_dim, hidden_dim, dtype=jnp.float32):
    """Deterministic synthetic parameters; Linear weights stored transposed
    as [in_features, out_features]."""
    names_shapes = [
        ("W_z", (input_dim, hidden_dim)), ("b_Wz", (1, hidden_dim)),
        ("U_z", (hidden_dim, hidden_dim)), ("b_Uz", (1, hidden_dim)),
        ("W_r", (input_dim, hidden_dim)), ("b_Wr", (1, hidden_dim)),
        ("U_r", (hidden_dim, hidden_dim)), ("b_Ur", (1, hidden_dim)),
        ("W_h", (input_dim, hidden_dim)), ("b_Wh", (1, hidden_dim)),
        ("U_h", (hidden_dim, hidden_dim)), ("b_Uh", (1, hidden_dim)),
        ("bias_h", (1, hidden_dim)),
        ("W_g", (hidden_dim, hidden_dim)), ("b_g", (1, hidden_dim)),
        ("W_l", (hidden_dim, hidden_dim)), ("b_l", (1, hidden_dim)),
    ]
    params = {}
    keys = jax.random.split(key, len(names_shapes))
    for k, (name, shape) in zip(keys, names_shapes):
        params[name] = (0.1 * jax.random.normal(k, shape)).astype(dtype)
    # match nn.Parameter(torch.zeros(hidden_dim)) for bias_h
    params["bias_h"] = jnp.zeros((1, hidden_dim), dtype)
    return params


def reference_gru_cell(x, h, p):
    """Pure-JAX reference matching the PyTorch forward exactly."""
    def lin(inp, w, b):
        return inp @ w + b
    z = jax.nn.sigmoid(lin(x, p["W_z"], p["b_Wz"]) + lin(h, p["U_z"], p["b_Uz"]))
    r = jax.nn.sigmoid(lin(x, p["W_r"], p["b_Wr"]) + lin(h, p["U_r"], p["b_Ur"]))
    ci = lin(x, p["W_h"], p["b_Wh"]) + lin(r * h, p["U_h"], p["b_Uh"]) + p["bias_h"]
    gate = jax.nn.sigmoid(lin(ci, p["W_g"], p["b_g"]))
    cand = lin(ci, p["W_l"], p["b_l"]) * gate
    return z * cand + (1.0 - z) * h


if __name__ == "__main__":
    INPUT_DIM, HIDDEN_DIM = 16, 32

    key = jax.random.PRNGKey(0)
    kx, kh, kp = jax.random.split(key, 3)
    params = init_params(kp, INPUT_DIM, HIDDEN_DIM)

    # Weights packed ONCE (outside any per-step loop).
    packed_f32 = pack_gru_params(params, compute_dtype=jnp.float32)
    packed_bf16 = pack_gru_params(params, compute_dtype=jnp.bfloat16)

    # --- Case 1: B=8, exact f32 semantics + bf16 fast path -----------------
    B = 8
    x = jax.random.normal(kx, (B, INPUT_DIM), jnp.float32)
    h = jax.random.normal(kh, (B, HIDDEN_DIM), jnp.float32)
    h_ref = reference_gru_cell(x, h, params)

    h_f32 = jax.block_until_ready(custom_gru_cell(x, h, packed_f32))
    assert h_f32.shape == (B, HIDDEN_DIM)
    assert jnp.allclose(h_f32, h_ref, atol=1e-5, rtol=1e-5), "f32 mismatch"

    h_bf16 = jax.block_until_ready(custom_gru_cell(x, h, packed_bf16))
    assert h_bf16.shape == (B, HIDDEN_DIM)
    assert jnp.allclose(h_bf16, h_ref, atol=5e-2, rtol=5e-2), "bf16 mismatch"

    # --- Case 2: uneven batch -> padding + in-kernel 2-way sub-tiling ------
    B2 = 33
    x2 = jax.random.normal(jax.random.PRNGKey(1), (B2, INPUT_DIM), jnp.float32)
    h2 = jax.random.normal(jax.random.PRNGKey(2), (B2, HIDDEN_DIM), jnp.float32)
    ref2 = reference_gru_cell(x2, h2, params)
    out2 = jax.block_until_ready(custom_gru_cell(x2, h2, packed_f32))
    assert out2.shape == (B2, HIDDEN_DIM)
    assert jnp.allclose(out2, ref2, atol=1e-5, rtol=1e-5), "padded-batch mismatch"

    print("KERNEL_OK")
</pallas_src>

<mosaic_0001>
module attributes {stable_mosaic.version = 11 : i64} {
  func.func @gru_cell_kernel(%arg0: i32, %arg1: memref<8x16xf32, #tpu.memory_space<vmem>>, %arg2: memref<8x128xf32, #tpu.memory_space<vmem>>, %arg3: memref<16x384xf32, #tpu.memory_space<vmem>>, %arg4: memref<1x384xf32, #tpu.memory_space<vmem>>, %arg5: memref<128x256xf32, #tpu.memory_space<vmem>>, %arg6: memref<128x128xf32, #tpu.memory_space<vmem>>, %arg7: memref<128x256xf32, #tpu.memory_space<vmem>>, %arg8: memref<1x256xf32, #tpu.memory_space<vmem>>, %arg9: memref<8x128xf32, #tpu.memory_space<vmem>>) attributes {dimension_semantics = [#tpu.dimension_semantics<parallel>], iteration_bounds = array<i64: 1>, scalar_prefetch = 0 : i64, scratch_operands = 0 : i64, tpu.core_type = #tpu.core_type<tc>, window_params = [{transform_indices = @transform_0, window_bounds = array<i64: 8, 16>}, {transform_indices = @transform_1, window_bounds = array<i64: 8, 128>}, {pipeline_mode = #tpu.pipeline_mode<synchronous>, transform_indices = @transform_2, window_bounds = array<i64: 16, 384>}, {pipeline_mode = #tpu.pipeline_mode<synchronous>, transform_indices = @transform_3, window_bounds = array<i64: 1, 384>}, {pipeline_mode = #tpu.pipeline_mode<synchronous>, transform_indices = @transform_4, window_bounds = array<i64: 128, 256>}, {pipeline_mode = #tpu.pipeline_mode<synchronous>, transform_indices = @transform_5, window_bounds = array<i64: 128, 128>}, {pipeline_mode = #tpu.pipeline_mode<synchronous>, transform_indices = @transform_6, window_bounds = array<i64: 128, 256>}, {pipeline_mode = #tpu.pipeline_mode<synchronous>, transform_indices = @transform_7, window_bounds = array<i64: 1, 256>}, {transform_indices = @transform_8, window_bounds = array<i64: 8, 128>}]} {
    %c0 = arith.constant 0 : index
    %c0_0 = arith.constant 0 : index
    %0 = vector.load %arg4[%c0, %c0_0] : memref<1x384xf32, #tpu.memory_space<vmem>>, vector<1x384xf32>
    %c0_1 = arith.constant 0 : index
    %c0_2 = arith.constant 0 : index
    %1 = vector.load %arg8[%c0_1, %c0_2] : memref<1x256xf32, #tpu.memory_space<vmem>>, vector<1x256xf32>
    %c0_3 = arith.constant 0 : index
    %c0_4 = arith.constant 0 : index
    %2 = vector.load %arg1[%c0_3, %c0_4] : memref<8x16xf32, #tpu.memory_space<vmem>>, vector<8x16xf32>
    %c0_5 = arith.constant 0 : index
    %c0_6 = arith.constant 0 : index
    %3 = vector.load %arg2[%c0_5, %c0_6] : memref<8x128xf32, #tpu.memory_space<vmem>>, vector<8x128xf32>
    %c0_7 = arith.constant 0 : index
    %c0_8 = arith.constant 0 : index
    %4 = vector.load %arg3[%c0_7, %c0_8] : memref<16x384xf32, #tpu.memory_space<vmem>>, vector<16x384xf32>
    %cst = arith.constant dense<0.000000e+00> : vector<8x384xf32>
    %5 = tpu.matmul %2, %4, %cst {dimension_numbers = #tpu.dot_dimension_numbers<[1], [0], [0], [1], [0, 0, 1, 1], [], []>} : vector<8x16xf32>, vector<16x384xf32>, vector<8x384xf32> -> vector<8x384xf32>
    %6 = vector.broadcast %0 : vector<1x384xf32> to vector<8x384xf32>
    %7 = arith.addf %5, %6 : vector<8x384xf32>
    %c0_9 = arith.constant 0 : index
    %c0_10 = arith.constant 0 : index
    %8 = vector.load %arg5[%c0_9, %c0_10] : memref<128x256xf32, #tpu.memory_space<vmem>>, vector<128x256xf32>
    %cst_11 = arith.constant dense<0.000000e+00> : vector<8x256xf32>
    %9 = tpu.matmul %3, %8, %cst_11 {dimension_numbers = #tpu.dot_dimension_numbers<[1], [0], [0], [1], [0, 0, 1, 1], [], []>} : vector<8x128xf32>, vector<128x256xf32>, vector<8x256xf32> -> vector<8x256xf32>
    %10 = vector.extract_strided_slice %7 {offsets = [0, 0], sizes = [8, 128], strides = [1, 1]} : vector<8x384xf32> to vector<8x128xf32>
    %11 = vector.extract_strided_slice %9 {offsets = [0, 0], sizes = [8, 128], strides = [1, 1]} : vector<8x256xf32> to vector<8x128xf32>
    %12 = arith.addf %10, %11 : vector<8x128xf32>
    %cst_12 = arith.constant 5.000000e-01 : f32
    %13 = vector.broadcast %cst_12 : f32 to vector<8x128xf32>
    %14 = arith.mulf %13, %12 : vector<8x128xf32>
    %15 = math.tanh %14 : vector<8x128xf32>
    %cst_13 = arith.constant 5.000000e-01 : f32
    %16 = vector.broadcast %cst_13 : f32 to vector<8x128xf32>
    %17 = arith.mulf %16, %15 : vector<8x128xf32>
    %cst_14 = arith.constant 5.000000e-01 : f32
    %18 = vector.broadcast %cst_14 : f32 to vector<8x128xf32>
    %19 = arith.addf %17, %18 : vector<8x128xf32>
    %20 = vector.extract_strided_slice %7 {offsets = [0, 128], sizes = [8, 128], strides = [1, 1]} : vector<8x384xf32> to vector<8x128xf32>
    %21 = vector.extract_strided_slice %9 {offsets = [0, 128], sizes = [8, 128], strides = [1, 1]} : vector<8x256xf32> to vector<8x128xf32>
    %22 = arith.addf %20, %21 : vector<8x128xf32>
    %cst_15 = arith.constant 5.000000e-01 : f32
    %23 = vector.broadcast %cst_15 : f32 to vector<8x128xf32>
    %24 = arith.mulf %23, %22 : vector<8x128xf32>
    %25 = math.tanh %24 : vector<8x128xf32>
    %cst_16 = arith.constant 5.000000e-01 : f32
    %26 = vector.broadcast %cst_16 : f32 to vector<8x128xf32>
    %27 = arith.mulf %26, %25 : vector<8x128xf32>
    %cst_17 = arith.constant 5.000000e-01 : f32
    %28 = vector.broadcast %cst_17 : f32 to vector<8x128xf32>
    %29 = arith.addf %27, %28 : vector<8x128xf32>
    %30 = vector.extract_strided_slice %7 {offsets = [0, 256], sizes = [8, 128], strides = [1, 1]} : vector<8x384xf32> to vector<8x128xf32>
    %31 = arith.mulf %29, %3 : vector<8x128xf32>
    %c0_18 = arith.constant 0 : index
    %c0_19 = arith.constant 0 : index
    %32 = vector.load %arg6[%c0_18, %c0_19] : memref<128x128xf32, #tpu.memory_space<vmem>>, vector<128x128xf32>
    %cst_20 = arith.constant dense<0.000000e+00> : vector<8x128xf32>
    %33 = tpu.matmul %31, %32, %cst_20 {dimension_numbers = #tpu.dot_dimension_numbers<[1], [0], [0], [1], [0, 0, 1, 1], [], []>} : vector<8x128xf32>, vector<128x128xf32>, vector<8x128xf32> -> vector<8x128xf32>
    %34 = arith.addf %30, %33 : vector<8x128xf32>
    %c0_21 = arith.constant 0 : index
    %c0_22 = arith.constant 0 : index
    %35 = vector.load %arg7[%c0_21, %c0_22] : memref<128x256xf32, #tpu.memory_space<vmem>>, vector<128x256xf32>
    %cst_23 = arith.constant dense<0.000000e+00> : vector<8x256xf32>
    %36 = tpu.matmul %34, %35, %cst_23 {dimension_numbers = #tpu.dot_dimension_numbers<[1], [0], [0], [1], [0, 0, 1, 1], [], []>} : vector<8x128xf32>, vector<128x256xf32>, vector<8x256xf32> -> vector<8x256xf32>
    %37 = vector.broadcast %1 : vector<1x256xf32> to vector<8x256xf32>
    %38 = arith.addf %36, %37 : vector<8x256xf32>
    %39 = vector.extract_strided_slice %38 {offsets = [0, 0], sizes = [8, 128], strides = [1, 1]} : vector<8x256xf32> to vector<8x128xf32>
    %cst_24 = arith.constant 5.000000e-01 : f32
    %40 = vector.broadcast %cst_24 : f32 to vector<8x128xf32>
    %41 = arith.mulf %40, %39 : vector<8x128xf32>
    %42 = math.tanh %41 : vector<8x128xf32>
    %cst_25 = arith.constant 5.000000e-01 : f32
    %43 = vector.broadcast %cst_25 : f32 to vector<8x128xf32>
    %44 = arith.mulf %43, %42 : vector<8x128xf32>
    %cst_26 = arith.constant 5.000000e-01 : f32
    %45 = vector.broadcast %cst_26 : f32 to vector<8x128xf32>
    %46 = arith.addf %44, %45 : vector<8x128xf32>
    %47 = vector.extract_strided_slice %38 {offsets = [0, 128], sizes = [8, 128], strides = [1, 1]} : vector<8x256xf32> to vector<8x128xf32>
    %48 = arith.mulf %47, %46 : vector<8x128xf32>
    %49 = arith.subf %48, %3 : vector<8x128xf32>
    %50 = arith.mulf %19, %49 : vector<8x128xf32>
    %51 = arith.addf %3, %50 : vector<8x128xf32>
    %c0_27 = arith.constant 0 : index
    %c0_28 = arith.constant 0 : index
    %52 = vector.load %arg9[%c0_27, %c0_28] : memref<8x128xf32, #tpu.memory_space<vmem>>, vector<8x128xf32>
    tpu.vector_store %arg9[%c0_27, %c0_28], %51 {strides = array<i32>} : memref<8x128xf32, #tpu.memory_space<vmem>>, vector<8x128xf32>,
    return
  }
  func.func @transform_0(%arg0: i32) -> (i32, i32) {
    %c0_i32 = arith.constant 0 : i32
    %c0_i32_0 = arith.constant 0 : i32
    return %arg0, %c0_i32 : i32, i32
  }
  func.func @transform_1(%arg0: i32) -> (i32, i32) {
    %c0_i32 = arith.constant 0 : i32
    %c0_i32_0 = arith.constant 0 : i32
    return %arg0, %c0_i32 : i32, i32
  }
  func.func @transform_2(%arg0: i32) -> (i32, i32) {
    %c0_i32 = arith.constant 0 : i32
    %c0_i32_0 = arith.constant 0 : i32
    %c0_i32_1 = arith.constant 0 : i32
    return %c0_i32, %c0_i32_0 : i32, i32
  }
  func.func @transform_3(%arg0: i32) -> (i32, i32) {
    %c0_i32 = arith.constant 0 : i32
    %c0_i32_0 = arith.constant 0 : i32
    %c0_i32_1 = arith.constant 0 : i32
    return %c0_i32, %c0_i32_0 : i32, i32
  }
  func.func @transform_4(%arg0: i32) -> (i32, i32) {
    %c0_i32 = arith.constant 0 : i32
    %c0_i32_0 = arith.constant 0 : i32
    %c0_i32_1 = arith.constant 0 : i32
    return %c0_i32, %c0_i32_0 : i32, i32
  }
  func.func @transform_5(%arg0: i32) -> (i32, i32) {
    %c0_i32 = arith.constant 0 : i32
    %c0_i32_0 = arith.constant 0 : i32
    %c0_i32_1 = arith.constant 0 : i32
    return %c0_i32, %c0_i32_0 : i32, i32
  }
  func.func @transform_6(%arg0: i32) -> (i32, i32) {
    %c0_i32 = arith.constant 0 : i32
    %c0_i32_0 = arith.constant 0 : i32
    %c0_i32_1 = arith.constant 0 : i32
    return %c0_i32, %c0_i32_0 : i32, i32
  }
  func.func @transform_7(%arg0: i32) -> (i32, i32) {
    %c0_i32 = arith.constant 0 : i32
    %c0_i32_0 = arith.constant 0 : i32
    %c0_i32_1 = arith.constant 0 : i32
    return %c0_i32, %c0_i32_0 : i32, i32
  }
  func.func @transform_8(%arg0: i32) -> (i32, i32) {
    %c0_i32 = arith.constant 0 : i32
    %c0_i32_0 = arith.constant 0 : i32
    return %arg0, %c0_i32 : i32, i32
  }
}

</mosaic_0001>

<bundles_post_ra>
// kernel: tpu_custom_call.1
= control target key start
LH: loop header
LB: loop body
LE: loop exit
PB: predicated region body
PF: predicated region fallthrough
CT: control target
= control target key end

     0   :  { %13 = vsyncpa [#allocation3], 0  ;;  %s980_s0 = inlined_call_operand.hbm [shape: f32[8,16], index: 0, kind: input, shape index: {}]   ;;  %s981_s1 = inlined_call_operand.hbm [shape: f32[8,128], index: 1, kind: input, shape index: {}]   ;;  %s982_s2 = inlined_call_operand.hbm [shape: f32[16,384], index: 2, kind: input, shape index: {}]   ;;  %s983_s3 = inlined_call_operand.vmem [shape: f32[1,384], index: 3, kind: input, shape index: {}]   ;;  %s984_s4 = inlined_call_operand.hbm [shape: f32[128,256], index: 4, kind: input, shape index: {}]   ;;  %s985_s5 = inlined_call_operand.hbm [shape: f32[128,128], index: 5, kind: input, shape index: {}]   ;;  %s986_s6 = inlined_call_operand.hbm [shape: f32[128,256], index: 6, kind: input, shape index: {}]   ;;  %s987_s7 = inlined_call_operand.vmem [shape: f32[1,256], index: 7, kind: input, shape index: {}]   ;;  %s988_s8 = inlined_call_operand.hbm [shape: f32[8,128], index: 8, kind: output, shape index: {}]  }
   0x1   :  { %14 = vsyncpa [#allocation6], 0 }
   0x2   :  { %15 = vsyncpa [#allocation9], 0 }
   0x3   :  { %16 = vsyncpa [#allocation12], 0 }
   0x4   :  { %17 = vsyncpa [#allocation4], 0  ;;  %s856_s27 = smov [#allocation5]   ;;  %s857_s29 = smov [#allocation8]  }
   0x5   :  { %s34_s28 = sshll.u32 %s856_s27, 4  ;;  %s57_s30 = sshll.u32 %s857_s29, 4  ;;  %s35_s28 = int_to_ptr.vmem [resolvable:$true] %s34_s28  ;;  %s58_s30 = int_to_ptr.vmem [resolvable:$true] %s57_s30 }
   0x6   :  { %s714_s9 = scalar_lea.vmem %s35_s28, 128  ;;  %p719_p1 = scmp.lt.s32.totalorder %s35_s28, %s35_s28 }
   0x7   :  { %p715_p0 = scmp.ne.s32.totalorder %s35_s28, %s714_s9  ;;  %p720_p2 = scmp.lt.s32.totalorder %s714_s9, %s714_s9 }
   0x9   :  { %p721_p3 = por %p720_p2, %p719_p1 }
   0xb   :  { %p722_p4 = pnand %p721_p3, %p715_p0 }
   0xd   :  { %725 = shalt.err (!%p722_p4)
}
   0xe   :  { %37 = dma.hbm_to_vmem [thread:$0]  %s981_s1, 128, %s35_s28, [#allocation6]  }
   0xf   :  { %s734_s12 = scalar_lea.vmem %s58_s30, 4096  ;;  %p739_p6 = scmp.lt.s32.totalorder %s58_s30, %s58_s30 }
  0x10   :  { %p735_p5 = scmp.ne.s32.totalorder %s58_s30, %s734_s12  ;;  %p740_p7 = scmp.lt.s32.totalorder %s734_s12, %s734_s12 }
  0x12   :  { %p741_p8 = por %p740_p7, %p739_p6 }
  0x14   :  { %p742_p9 = pnand %p741_p8, %p735_p5 }
  0x16   :  { %745 = shalt.err (!%p742_p9)
}
  0x17   :  { %s858_s13 = smov 256   ;;  %s859_s14 = smov 16  }
  0x18   :  { %63 = dma.hbm_to_vmem [thread:$0]  %s984_s4, 4096, %s58_s30, [#allocation9], %s858_s13, %s858_s13, %s859_s14  }
  0x19   :  { %s860_s17 = smov [#allocation2]   ;;  %s861_s19 = smov [#allocation7]  }
  0x1a   :  { %s24_s18 = sshll.u32 %s860_s17, 4  ;;  %s43_s1 = sshll.u32 %s861_s19, 4  ;;  %s25_s18 = int_to_ptr.vmem [resolvable:$true] %s24_s18  ;;  %s44_s1 = int_to_ptr.vmem [resolvable:$true] %s43_s1 }
  0x1b   :  { %s754_s20 = scalar_lea.vmem %s25_s18, 128  ;;  %p759_p11 = scmp.lt.s32.totalorder %s25_s18, %s25_s18 }
  0x1c   :  { %p755_p10 = scmp.ne.s32.totalorder %s25_s18, %s754_s20  ;;  %p760_p12 = scmp.lt.s32.totalorder %s754_s20, %s754_s20 }
  0x1e   :  { %p761_p13 = por %p760_p12, %p759_p11 }
  0x20   :  { %p762_p0 = pnand %p761_p13, %p755_p10 }
  0x22   :  { %765 = shalt.err (!%p762_p0)
}
  0x23   :  { %27 = dma.hbm_to_vmem [thread:$0]  %s980_s0, 128, %s25_s18, [#allocation3]  }
  0x24   :  { %s774_s23 = scalar_lea.vmem %s44_s1, 768  ;;  %p779_p2 = scmp.lt.s32.totalorder %s44_s1, %s44_s1 }
  0x25   :  { %p775_p1 = scmp.ne.s32.totalorder %s44_s1, %s774_s23  ;;  %p780_p3 = scmp.lt.s32.totalorder %s774_s23, %s774_s23 }
  0x27   :  { %p781_p4 = por %p780_p3, %p779_p2 }
  0x29   :  { %p782_p5 = pnand %p781_p4, %p775_p1 }
  0x2b   :  { %785 = shalt.err (!%p782_p5)
}
  0x2c   :  { %s862_s4 = smov 384   ;;  %s863_s24 = smov 24  }
  0x2d   :  { %49 = dma.hbm_to_vmem [thread:$0]  %s982_s2, 768, %s44_s1, [#allocation6], %s862_s4, %s862_s4, %s863_s24  }
  0x2e   :  { %s864_s27 = smov [#allocation10]  }
  0x2f   :  { %s69_s28 = sshll.u32 %s864_s27, 4  ;;  %s70_s28 = int_to_ptr.vmem [resolvable:$true] %s69_s28 }
  0x30   :  { %s794_s29 = scalar_lea.vmem %s70_s28, 2048  ;;  %p799_p7 = scmp.lt.s32.totalorder %s70_s28, %s70_s28 }
  0x31   :  { %p795_p6 = scmp.ne.s32.totalorder %s70_s28, %s794_s29  ;;  %p800_p8 = scmp.lt.s32.totalorder %s794_s29, %s794_s29 }
  0x33   :  { %p801_p9 = por %p800_p8, %p799_p7 }
  0x35   :  { %p802_p10 = pnand %p801_p9, %p795_p6 }
  0x37   :  { %805 = shalt.err (!%p802_p10)
}
  0x38   :  { %s865_s0 = smov 128   ;;  %s866_s30 = smov 8  }
  0x39   :  { %75 = dma.hbm_to_vmem [thread:$0]  %s985_s5, 2048, %s70_s28, [#allocation9], %s865_s0, %s865_s0, %s866_s30  }
  0x3a   :  { %s867_s11 = smov [#allocation11]  }
  0x3b   :  { %s81_s12 = sshll.u32 %s867_s11, 4  ;;  %s82_s12 = int_to_ptr.vmem [resolvable:$true] %s81_s12 }
  0x3c   :  { %s814_s2 = scalar_lea.vmem %s82_s12, 4096  ;;  %p819_p12 = scmp.lt.s32.totalorder %s82_s12, %s82_s12 }
  0x3d   :  { %p815_p11 = scmp.ne.s32.totalorder %s82_s12, %s814_s2  ;;  %p820_p13 = scmp.lt.s32.totalorder %s814_s2, %s814_s2 }
  0x3f   :  { %p821_p0 = por %p820_p13, %p819_p12 }
  0x41   :  { %p822_p1 = pnand %p821_p0, %p815_p11 }
  0x43   :  { %825 = shalt.err (!%p822_p1)
}
  0x44   :  { %87 = dma.hbm_to_vmem [thread:$0]  %s986_s6, 4096, %s82_s12, [#allocation12], %s858_s13, %s858_s13, %s859_s14  }
  0x45   :  { %846 = dma.done.wait [#allocation3], 128  }
  0x46   :  { %847 = vsyncadd [#allocation3], 4294967168 }
  0x47   :  { %848 = dma.done.wait [#allocation6], 896  }
  0x48   :  { %849 = vsyncadd [#allocation6], 4294966400 }
  0x49   :  { %850 = dma.done.wait [#allocation9], 6144  }
  0x4a   :  { %851 = vsyncadd [#allocation9], 4294961152 }
  0x4b   :  { %852 = dma.done.wait [#allocation12], 4096  }
  0x4c   :  { %853 = vsyncadd [#allocation12], 4294963200  ;;  %v868_v0 = vmov 0.0   ;;  %v310_v1 = vld [vmem:[#allocation8 + $0xf8] sm:$0xff]  ;;  %v309_v2 = vld [vmem:[#allocation8 + $0xf0] sm:$0xff]  ;;  %vm134_vm0 = vcmask 130048  }
  0x4d   :  { %202 = vmatprep.mubr.f32.mxu1 %v868_v0  ;;  %375 = vmatprep.mubr.f32.mxu0 %v868_v0  ;;  %v308_v3 = vld [vmem:[#allocation8 + $0xe8] sm:$0xff]  ;;  %v307_v4 = vld [vmem:[#allocation8 + $0xe0] sm:$0xff]  ;;  %v306_v5 = vld [vmem:[#allocation8 + $0xd8] sm:$0xff]  ;;  %vm869_vm1 = vmmov 0  }
  0x4e   :  { %311 = vmatprep.subr.mxu0 %v310_v1  ;;  %v305_v6 = vld [vmem:[#allocation8 + $0xd0] sm:$0xff]  ;;  %v304_v7 = vld [vmem:[#allocation8 + $0xc8] sm:$0xff]  ;;  %v303_v8 = vld [vmem:[#allocation8 + $0xc0] sm:$0xff] }
  0x4f   :  { %312 = vmatpush1.msra.mxu0 %v309_v2  ;;  %v302_v9 = vld [vmem:[#allocation8 + $0xb8] sm:$0xff]  ;;  %v301_v10 = vld [vmem:[#allocation8 + $0xb0] sm:$0xff]  ;;  %v300_v11 = vld [vmem:[#allocation8 + $0xa8] sm:$0xff] }
  0x50   :  { %313 = vmatprep.subr.mxu0 %v308_v3  ;;  %v116_v12 = vld [vmem:[#allocation7 + $0x20] sm:$0xff]  ;;  %v115_v13 = vld [vmem:[#allocation7 + $0x18] sm:$0xff]  ;;  %v299_v14 = vld [vmem:[#allocation8 + $0xa0] sm:$0xff] }
  0x51   :  { %314 = vmatpush1.msra.mxu0 %v307_v4  ;;  %166 = vmatprep.subr.mxu1 %v116_v12  ;;  %v113_v15 = vld [vmem:[#allocation7 + $0x8] sm:$0xff]  ;;  %v112_v17 = vld [vmem:[#allocation7] sm:$0xff]  ;;  %v110_v18 = vld [vmem:[#allocation2] sm:$0xff] }
  0x52   :  { %315 = vmatprep.subr.mxu0 %v306_v5  ;;  %v298_v16 = vld [vmem:[#allocation8 + $0x98] sm:$0xff]  ;;  %167 = vmatpush1.msra.mxu1 %v115_v13  ;;  %v297_v19 = vld [vmem:[#allocation8 + $0x90] sm:$0xff]  ;;  %v296_v20 = vld [vmem:[#allocation8 + $0x88] sm:$0xff] }
  0x53   :  { %316 = vmatpush1.msra.mxu0 %v305_v6  ;;  %168 = vmatprep.subr.mxu1 %v113_v15  ;;  %v117_v21 = vld [vmem:[#allocation7 + $0x28] sm:$0xff]  ;;  %v295_v22 = vld [vmem:[#allocation8 + $0x80] sm:$0xff]  ;;  %v293_v25 = vld [vmem:[#allocation8 + $0x70] sm:$0xff] }
  0x54   :  { %317 = vmatprep.subr.mxu0 %v304_v7  ;;  %169 = vmatpush1.msra.mxu1 %v112_v17  ;;  %v294_v23 = vld [vmem:[#allocation8 + $0x78] sm:$0xff]  ;;  %v114_v24 = vld [vmem:[#allocation7 + $0x10] sm:$0xff]  ;;  %v292_v26 = vld [vmem:[#allocation8 + $0x68] sm:$0xff] }
  0x55   :  { %318 = vmatpush1.msra.mxu0 %v303_v8  ;;  %621 = vmatmul.mubr.msk.f32.vlgmr.msra.gmra.mxu1 %vm134_vm0, %v110_v18  ;;  %v291_v27 = vld [vmem:[#allocation8 + $0x60] sm:$0xff]  ;;  %v290_v28 = vld [vmem:[#allocation8 + $0x58] sm:$0xff]  ;;  %v289_v29 = vld [vmem:[#allocation8 + $0x50] sm:$0xff] }
  0x56   :  { %319 = vmatprep.subr.mxu0 %v302_v9  ;;  %643 = vmatprep.subr.mxu1 %v868_v0  ;;  %v288_v30 = vld [vmem:[#allocation8 + $0x48] sm:$0xff]  ;;  %v287_v31 = vld [vmem:[#allocation8 + $0x40] sm:$0xff]  ;;  %v286_v32 = vld [vmem:[#allocation8 + $0x38] sm:$0xff] }
  0x57   :  { %320 = vmatpush1.msra.mxu0 %v301_v10  ;;  %644 = vmatpush3.msra.mxu1 %v117_v21  ;;  %v285_v33 = vld [vmem:[#allocation8 + $0x30] sm:$0xff]  ;;  %v284_v34 = vld [vmem:[#allocation8 + $0x28] sm:$0xff]  ;;  %v283_v35 = vld [vmem:[#allocation8 + $0x20] sm:$0xff] }
  0x58   :  { %321 = vmatprep.subr.mxu0 %v300_v11  ;;  %645 = vmatprep.subr.mxu1 %v868_v0  ;;  %v282_v36 = vld [vmem:[#allocation8 + $0x18] sm:$0xff]  ;;  %v281_v37 = vld [vmem:[#allocation8 + $0x10] sm:$0xff]  ;;  %v280_v38 = vld [vmem:[#allocation8 + $0x8] sm:$0xff] }
  0x59   :  { %322 = vmatpush1.msra.mxu0 %v299_v14  ;;  %646 = vmatpush3.msra.mxu1 %v114_v24  ;;  %v279_v39 = vld [vmem:[#allocation8] sm:$0xff]  ;;  %v949_v40 = vld [vmem:[#allocation5] sm:$0xff]  ;;  %v408_v41 = vld [vmem:[#allocation10 + $0x78] sm:$0xff] }
  0x5a   :  { %323 = vmatprep.subr.mxu0 %v298_v16  ;;  %647 = vmatprep.mubr.msk.f32.mxu1 %vm869_vm1, %v868_v0  ;;  %v407_v42 = vld [vmem:[#allocation10 + $0x70] sm:$0xff]  ;;  %v406_v43 = vld [vmem:[#allocation10 + $0x68] sm:$0xff]  ;;  %v405_v44 = vld [vmem:[#allocation10 + $0x60] sm:$0xff] }
  0x5b   :  { %324 = vmatpush1.msra.mxu0 %v297_v19  ;;  %648 = vmatmul.mubr.msk.f32.vlgmr.msra.gmra.mxu1 %vm134_vm0, %v110_v18  ;;  %v404_v45 = vld [vmem:[#allocation10 + $0x58] sm:$0xff]  ;;  %v403_v46 = vld [vmem:[#allocation10 + $0x50] sm:$0xff]  ;;  %v402_v47 = vld [vmem:[#allocation10 + $0x48] sm:$0xff] }
  0x5c   :  { %325 = vmatprep.subr.mxu0 %v296_v20  ;;  %650 = vmatprep.subr.mxu1 %v868_v0  ;;  %v401_v48 = vld [vmem:[#allocation10 + $0x40] sm:$0xff]  ;;  %v400_v49 = vld [vmem:[#allocation10 + $0x38] sm:$0xff]  ;;  %v399_v50 = vld [vmem:[#allocation10 + $0x30] sm:$0xff] }
  0x5d   :  { %326 = vmatpush1.msra.mxu0 %v295_v22  ;;  %682 = vmatprep.mubr.msk.f32.mxu1 %vm869_vm1, %v868_v0  ;;  %v398_v51 = vld [vmem:[#allocation10 + $0x28] sm:$0xff]  ;;  %v397_v52 = vld [vmem:[#allocation10 + $0x20] sm:$0xff]  ;;  %v396_v53 = vld [vmem:[#allocation10 + $0x18] sm:$0xff] }
  0x5e   :  { %327 = vmatprep.subr.mxu0 %v294_v23  ;;  %651 = vmatpush3.msra.mxu1 %v408_v41  ;;  %v395_v54 = vld [vmem:[#allocation10 + $0x10] sm:$0xff]  ;;  %v394_v55 = vld [vmem:[#allocation10 + $0x8] sm:$0xff]  ;;  %v393_v56 = vld [vmem:[#allocation10] sm:$0xff]  ;;  %v119_v23 = vlaneseq }
  0x5f   :  { %328 = vmatpush1.msra.mxu0 %v293_v25  ;;  %652 = vmatprep.subr.mxu1 %v868_v0  ;;  %v511_v57 = vld [vmem:[#allocation11 + $0xf8] sm:$0xff]  ;;  %v510_v58 = vld [vmem:[#allocation11 + $0xf0] sm:$0xff]  ;;  %v509_v59 = vld [vmem:[#allocation11 + $0xe8] sm:$0xff] }
  0x60   :  { %329 = vmatprep.subr.mxu0 %v292_v26  ;;  %653 = vmatpush3.msra.mxu1 %v407_v42  ;;  %v508_v60 = vld [vmem:[#allocation11 + $0xe0] sm:$0xff]  ;;  %v507_v61 = vld [vmem:[#allocation11 + $0xd8] sm:$0xff]  ;;  %v506_v62 = vld [vmem:[#allocation11 + $0xd0] sm:$0xff]  ;;  %v120_v25 = vshrl.u32 %v119_v23, 7 }
  0x61   :  { %330 = vmatpush1.msra.mxu0 %v291_v27  ;;  %654 = vmatprep.subr.mxu1 %v868_v0  ;;  %v505_v63 = vld [vmem:[#allocation11 + $0xc8] sm:$0xff]  ;;  %v504_v1 = vld [vmem:[#allocation11 + $0xc0] sm:$0xff]  ;;  %v503_v2 = vld [vmem:[#allocation11 + $0xb8] sm:$0xff] }
  0x62   :  { %331 = vmatprep.subr.mxu0 %v290_v28  ;;  %655 = vmatpush3.msra.mxu1 %v406_v43  ;;  %v502_v3 = vld [vmem:[#allocation11 + $0xb0] sm:$0xff]  ;;  %v500_v4 = vld [vmem:[#allocation11 + $0xa0] sm:$0xff]  ;;  %v499_v5 = vld [vmem:[#allocation11 + $0x98] sm:$0xff]  ;;  %v121_v28 = vsub.s32 0, %v120_v25 }
  0x63   :  { %332 = vmatpush1.msra.mxu0 %v289_v29  ;;  %656 = vmatprep.subr.mxu1 %v868_v0  ;;  %v498_v6 = vld [vmem:[#allocation11 + $0x90] sm:$0xff]  ;;  %v497_v7 = vld [vmem:[#allocation11 + $0x88] sm:$0xff]  ;;  %v496_v8 = vld [vmem:[#allocation11 + $0x80] sm:$0xff] }
  0x64   :  { %333 = vmatprep.subr.mxu0 %v288_v30  ;;  %657 = vmatpush3.msra.mxu1 %v405_v44  ;;  %v495_v9 = vld [vmem:[#allocation11 + $0x78] sm:$0xff]  ;;  %v494_v10 = vld [vmem:[#allocation11 + $0x70] sm:$0xff]  ;;  %v493_v11 = vld [vmem:[#allocation11 + $0x68] sm:$0xff] }
  0x65   :  { %334 = vmatpush1.msra.mxu0 %v287_v31  ;;  %658 = vmatprep.subr.mxu1 %v868_v0  ;;  %v492_v12 = vld [vmem:[#allocation11 + $0x60] sm:$0xff]  ;;  %v491_v13 = vld [vmem:[#allocation11 + $0x58] sm:$0xff]  ;;  %v490_v14 = vld [vmem:[#allocation11 + $0x50] sm:$0xff]  ;;  %v125_v31 = vsub.s32 1, %v120_v25 }
  0x66   :  { %335 = vmatprep.subr.mxu0 %v286_v32  ;;  %659 = vmatpush3.msra.mxu1 %v404_v45  ;;  %v489_v15 = vld [vmem:[#allocation11 + $0x48] sm:$0xff]  ;;  %v488_v16 = vld [vmem:[#allocation11 + $0x40] sm:$0xff]  ;;  %v487_v17 = vld [vmem:[#allocation11 + $0x38] sm:$0xff] }
  0x67   :  { %336 = vmatpush1.msra.mxu0 %v285_v33  ;;  %660 = vmatprep.subr.mxu1 %v868_v0  ;;  %v486_v18 = vld [vmem:[#allocation11 + $0x30] sm:$0xff]  ;;  %v485_v19 = vld [vmem:[#allocation11 + $0x28] sm:$0xff]  ;;  %v484_v20 = vld [vmem:[#allocation11 + $0x20] sm:$0xff] }
  0x68   :  { %337 = vmatprep.subr.mxu0 %v284_v34  ;;  %661 = vmatpush3.msra.mxu1 %v403_v46  ;;  %v483_v21 = vld [vmem:[#allocation11 + $0x18] sm:$0xff]  ;;  %v108_v29 = vld [vmem:[%s983_s3] sm:$0x7]  ;;  %v482_v45 = vld [vmem:[#allocation11 + $0x10] sm:$0xff] }
  0x69   :  { %338 = vmatpush1.msra.mxu0 %v283_v35  ;;  %662 = vmatprep.subr.mxu1 %v868_v0  ;;  %v122_v30 = vrot.slane %v108_v29, %v121_v28  ;;  %v126_v33 = vrot.slane %v108_v29, %v125_v31  ;;  %v481_v46 = vld [vmem:[#allocation11 + $0x8] sm:$0xff] }
  0x6a   :  { %339 = vmatprep.subr.mxu0 %v282_v36  ;;  %663 = vmatpush3.msra.mxu1 %v402_v47  ;;  %v480_v47 = vld [vmem:[#allocation11] sm:$0xff] }
  0x6b   :  { %340 = vmatpush1.msra.mxu0 %v281_v37  ;;  %664 = vmatprep.subr.mxu1 %v868_v0 }
  0x6c   :  { %341 = vmatprep.subr.mxu0 %v280_v38  ;;  %665 = vmatpush3.msra.mxu1 %v401_v48  ;;  %v129_v48 = vsub.s32 2, %v120_v25 }
  0x6d   :  { %342 = vmatpush1.msra.mxu0 %v279_v39  ;;  %666 = vmatprep.subr.mxu1 %v868_v0 }
  0x6e   :  { %376 = vmatmul.mubr.f32.vlgmr.msra.gmra.mxu0 %v949_v40  ;;  %667 = vmatpush3.msra.mxu1 %v400_v49  ;;  %v130_v49 = vrot.slane %v108_v29, %v129_v48 }
  0x6f   :  { %587 = vmatprep.mubr.f32.mxu0 %v868_v0  ;;  %668 = vmatprep.subr.mxu1 %v868_v0 }
  0x70   :  { %669 = vmatpush3.msra.mxu1 %v399_v50  ;;  %523 = vmatprep.subr.mxu0 %v511_v57 }
  0x71   :  { %670 = vmatprep.subr.mxu1 %v868_v0  ;;  %524 = vmatpush1.msra.mxu0 %v510_v58 }
  0x72   :  { %671 = vmatpush3.msra.mxu1 %v398_v51  ;;  %525 = vmatprep.subr.mxu0 %v509_v59 }
  0x73   :  { %672 = vmatprep.subr.mxu1 %v868_v0  ;;  %526 = vmatpush1.msra.mxu0 %v508_v60 }
  0x74   :  { %673 = vmatpush3.msra.mxu1 %v397_v52  ;;  %527 = vmatprep.subr.mxu0 %v507_v61 }
  0x75   :  { %674 = vmatprep.subr.mxu1 %v868_v0  ;;  %528 = vmatpush1.msra.mxu0 %v506_v62 }
  0x76   :  { %675 = vmatpush3.msra.mxu1 %v396_v53  ;;  %529 = vmatprep.subr.mxu0 %v505_v63 }
  0x77   :  { %676 = vmatprep.subr.mxu1 %v868_v0  ;;  %530 = vmatpush1.msra.mxu0 %v504_v1 }
  0x78   :  { %677 = vmatpush3.msra.mxu1 %v395_v54  ;;  %531 = vmatprep.subr.mxu0 %v503_v2  ;;  %v109_v54 = vld [vmem:[%s987_s7] sm:$0x3]  ;;  %s870_s7 = smov [#allocation13]  }
  0x79   :  { %678 = vmatprep.subr.mxu1 %v868_v0  ;;  %532 = vmatpush1.msra.mxu0 %v502_v3  ;;  %v520_v61 = vrot.slane %v109_v54, %v125_v31  ;;  %s609_s14 = sshll.u32 %s870_s7, 4  ;;  %s610_s14 = int_to_ptr.vmem [resolvable:$true] %s609_s14 }
  0x7a   :  { %679 = vmatpush3.msra.mxu1 %v394_v55  ;;  %v516_v55 = vrot.slane %v109_v54, %v121_v28  ;;  %s826_s17 = scalar_lea.vmem %s610_s14, 128  ;;  %p831_p3 = scmp.lt.s32.totalorder %s610_s14, %s610_s14 }
  0x7b   :  { %680 = vmatprep.subr.mxu1 %v868_v0  ;;  %v501_v0 = vld [vmem:[#allocation11 + $0xa8] sm:$0xff]  ;;  %p827_p2 = scmp.ne.s32.totalorder %s610_s14, %s826_s17  ;;  %p832_p4 = scmp.lt.s32.totalorder %s826_s17, %s826_s17 }
  0x7c   :  { %681 = vmatpush3.msra.mxu1 %v393_v56  ;;  %533 = vmatprep.subr.mxu0 %v501_v0 }
  0x7d   :  { %534 = vmatpush1.msra.mxu0 %v500_v4  ;;  %p833_p5 = por %p832_p4, %p831_p3 }
  0x7e   :  { %535 = vmatprep.subr.mxu0 %v499_v5 }
  0x7f   :  { %536 = vmatpush1.msra.mxu0 %v498_v6  ;;  %p834_p6 = pnand %p833_p5, %p827_p2 }
  0x80   :  { %537 = vmatprep.subr.mxu0 %v497_v7 }
  0x81   :  { %538 = vmatpush1.msra.mxu0 %v496_v8 }
  0x82   :  { %539 = vmatprep.subr.mxu0 %v495_v9 }
  0x83   :  { %540 = vmatpush1.msra.mxu0 %v494_v10 }
  0x84   :  { %541 = vmatprep.subr.mxu0 %v493_v11 }
  0x85   :  { %542 = vmatpush1.msra.mxu0 %v492_v12 }
  0x86   :  { %543 = vmatprep.subr.mxu0 %v491_v13 }
  0x87   :  { %544 = vmatpush1.msra.mxu0 %v490_v14 }
  0x88   :  { %545 = vmatprep.subr.mxu0 %v489_v15 }
  0x89   :  { %546 = vmatpush1.msra.mxu0 %v488_v16 }
  0x8a   :  { %547 = vmatprep.subr.mxu0 %v487_v17 }
  0x8b   :  { %548 = vmatpush1.msra.mxu0 %v486_v18 }
  0x8c   :  { %549 = vmatprep.subr.mxu0 %v485_v19 }
  0x8d   :  { %550 = vmatpush1.msra.mxu0 %v484_v20 }
  0x8e   :  { %551 = vmatprep.subr.mxu0 %v483_v21 }
  0x8f   :  { %552 = vmatpush1.msra.mxu0 %v482_v45 }
  0x90   :  { %553 = vmatprep.subr.mxu0 %v481_v46 }
  0x91   :  { %554 = vmatpush1.msra.mxu0 %v480_v47 }
 0x115   :  { %v204_v22 = vpop.f32.mrf.mxu1 }
 0x116   :  { %v205_v32 = vadd.f32 %v204_v22, %v122_v30 }
 0x117   :  { %v206_v24 = vpop.f32.mrf.mxu1 }
 0x118   :  { %v207_v35 = vadd.f32 %v206_v24, %v126_v33 }
 0x11b   :  { %v275_v26 = vpop.f32.mrf.mxu1 }
 0x11c   :  { %v276_v50 = vadd.f32 %v275_v26, %v130_v49 }
 0x11d   :  { %v649_v27 = vpop.f32.mrf.mxu1 }
 0x12e   :  { %v377_v34 = vpop.f32.mrf.mxu0 }
 0x12f   :  { %v382_v36 = vadd.f32 %v377_v34, %v205_v32 }
 0x130   :  { %v379_v37 = vpop.f32.mrf.mxu0 }
 0x131   :  { %v387_v38 = vadd.f32 %v379_v37, %v207_v35  ;;  %v383_v56 = vmul.f32 0.5, %v382_v36 }
 0x133   :  { %v388_v39 = vmul.f32 0.5, %v387_v38 }
 0x135   :  { %700 = vtanh.f32 %v388_v39 }
 0x136   :  { %702 = vtanh.f32 %v383_v56 }
 0x142   :  { %v701_v41 = vpop.eup %700 }
 0x143   :  { %v390_v42 = vmul.f32 0.5, %v701_v41  ;;  %v703_v60 = vpop.eup %702 }
 0x144   :  { %v385_v2 = vmul.f32 0.5, %v703_v60 }
 0x145   :  { %v391_v43 = vadd.f32 0.5, %v390_v42 }
 0x146   :  { %v386_v5 = vadd.f32 0.5, %v385_v2 }
 0x147   :  { %v392_v44 = vmul.f32 %v391_v43, %v949_v40 }
 0x149   :  { %683 = vmatmul.mubr.f32.vlgmr.msra.gmra.mxu1 %v392_v44 }
 0x209   :  { %v475_v51 = vpop.f32.mrf.mxu1 }
 0x20a   :  { %v479_v52 = vadd.f32 %v475_v51, %v276_v50 }
 0x20b   :  { %v684_v53 = vpop.f32.mrf.mxu1 }
 0x20c   :  { %588 = vmatmul.mubr.f32.vlgmr.msra.gmra.mxu0 %v479_v52 }
 0x2cc   :  { %v589_v57 = vpop.f32.mrf.mxu0 }
 0x2cd   :  { %v590_v58 = vadd.f32 %v589_v57, %v516_v55 }
 0x2ce   :  { %v591_v63 = vpop.f32.mrf.mxu0 }
 0x2cf   :  { %v594_v59 = vmul.f32 0.5, %v590_v58  ;;  %v592_v3 = vadd.f32 %v591_v63, %v520_v61 }
 0x2d1   :  { %704 = vtanh.f32 %v594_v59 }
 0x2de   :  { %v705_v62 = vpop.eup %704 }
 0x2df   :  { %v596_v1 = vmul.f32 0.5, %v705_v62 }
 0x2e1   :  { %v597_v0 = vadd.f32 0.5, %v596_v1 }
 0x2e3   :  { %v598_v4 = vmul.f32 %v597_v0, %v592_v3 }
 0x2e5   :  { %v599_v6 = vsub.f32 %v598_v4, %v949_v40 }
 0x2e7   :  { %v600_v7 = vmul.f32 %v599_v6, %v386_v5 }
 0x2e9   :  { %v601_v8 = vadd.f32 %v600_v7, %v949_v40 }
 0x2eb   :  { %602 = vst [vmem:[#allocation13] sm:$0xff] %v601_v8 }
 0x2ec   :  { %837 = shalt.err (!%p834_p6)
}
 0x2ed   :  { %612 = dma.vmem_to_hbm [thread:$0]  %s610_s14, 128, %s988_s8, [#allocation4]  }
 0x2ee   :  { %854 = dma.done.wait [#allocation4], 128  }
 0x2ef   :  { %855 = vsyncadd [#allocation4], 4294967168 }
 0x2f0   :  { %616 = vsyncpa [#allocation3], 1 }
 0x2f1   :  { %617 = vsyncpa [#allocation6], 1 }
 0x2f2   :  { %618 = vsyncpa [#allocation9], 1 }
 0x2f3   :  { %619 = vsyncpa [#allocation12], 1 }
 0x2f4   :  { %620 = vsyncpa [#allocation4], 1 }

</bundles_post_ra>
